<compile_context>
chip_gen: v7x
topology: tpu7x:2x2x1
jax: 0.10.0
libtpu: 0.0.40
codegen_flags: <defaults>
</compile_context>

<pallas_src>
import jax
import jax.numpy as jnp
from jax import lax
from jax.experimental import pallas as pl
from jax.experimental.pallas import tpu as pltpu


N_HIDDEN = 20            # hidden units of the torch module
CHUNK_ROWS = 8           # strip-mine granularity (one f32 sublane tile)
MAX_BLOCK_ROWS = 512     # 512 x 1024 f32 = 2 MiB per pipelined buffer
SMALL_N_THRESHOLD = 64 * 1024   # below this keep the slab 128 lanes wide


def mlp_kernel(params_ref, x_ref, o_ref):
    # params_ref: SMEM f32[2*N_HIDDEN + 2] = [c(20) | d(20) | A | B]
    # x_ref/o_ref: VMEM f32[block_rows, lanes]
    #
    # Hoist all scalar SMEM reads once, above the strip loop.
    c = [params_ref[j] for j in range(N_HIDDEN)]
    d = [params_ref[N_HIDDEN + j] for j in range(N_HIDDEN)]
    a_lin = params_ref[2 * N_HIDDEN]
    b_lin = params_ref[2 * N_HIDDEN + 1]

    block_rows = x_ref.shape[0]           # static
    n_chunks = block_rows // CHUNK_ROWS   # block_rows is a multiple of CHUNK_ROWS

    def chunk(ci, carry):
        r = pl.multiple_of(ci * CHUNK_ROWS, CHUNK_ROWS)
        xc = x_ref[pl.ds(r, CHUNK_ROWS), :]
        acc = xc * a_lin + b_lin
        # Unrolled 20-term |.|-chain: pure VPU, ~20 live vregs max.
        for j in range(N_HIDDEN):
            acc = acc + d[j] * jnp.abs(xc + c[j])
        o_ref[pl.ds(r, CHUNK_ROWS), :] = acc
        return carry

    lax.fori_loop(0, n_chunks, chunk, 0)


def pack_params(w1, b1, w2, b2):
    """Fold the 1->20->1 MLP into y = A*x + B + sum_j d_j*|x + c_j|."""
    w1f = jnp.asarray(w1, jnp.float32).reshape(-1)   # (20,)
    b1f = jnp.asarray(b1, jnp.float32).reshape(-1)   # (20,)
    w2f = jnp.asarray(w2, jnp.float32).reshape(-1)   # (20,)
    b2f = jnp.asarray(b2, jnp.float32).reshape(-1)   # (1,)

    nz = w1f != 0.0
    safe_w1 = jnp.where(nz, w1f, 1.0)
    a_lin = 0.5 * jnp.sum(jnp.where(nz, w2f * w1f, 0.0))
    b_lin = (0.5 * jnp.sum(jnp.where(nz, w2f * b1f, 0.0)) + b2f[0]
             # w1_j == 0 units are constants: fold w2_j*relu(b1_j) into the bias.
             + jnp.sum(jnp.where(nz, 0.0, w2f * jnp.maximum(b1f, 0.0))))
    c = jnp.where(nz, b1f / safe_w1, 0.0)
    d = jnp.where(nz, 0.5 * w2f * jnp.abs(w1f), 0.0)
    return jnp.concatenate([c, d, a_lin[None], b_lin[None]]).astype(jnp.float32)


def _cdiv(a, b):
    return -(-a // b)


@jax.jit
def net_forward(x, packed_params):
    """x: f32[N, 1] -> f32[N, 1], equivalent to predict(relu(hidden(x)))."""
    n = x.shape[0]

    # Lane-dense slab layout: (rows, lanes), rows a multiple of CHUNK_ROWS.
    lanes = 128 if n <= SMALL_N_THRESHOLD else 1024
    rows = max(CHUNK_ROWS, _cdiv(_cdiv(n, lanes), CHUNK_ROWS) * CHUNK_ROWS)

    # Block size: big enough to amortize per-step overhead, but aim for >= 2
    # grid blocks when rows allow so both v7x TensorCores get work.
    if rows >= 2 * CHUNK_ROWS:
        block_rows = min(MAX_BLOCK_ROWS,
                         _cdiv(_cdiv(rows, 2), CHUNK_ROWS) * CHUNK_ROWS)
    else:
        block_rows = rows
    n_blocks = _cdiv(rows, block_rows)
    rows = n_blocks * block_rows
    padded = rows * lanes

    # Single pad; the contiguous reshape is free.
    x_slab = jnp.pad(x.reshape(-1), (0, padded - n)).reshape(rows, lanes)

    out_slab = pl.pallas_call(
        mlp_kernel,
        out_shape=jax.ShapeDtypeStruct((rows, lanes), jnp.float32),
        grid_spec=pltpu.PrefetchScalarGridSpec(
            num_scalar_prefetch=0,
            grid=(n_blocks,),
            in_specs=[
                # 42 packed scalars live in SMEM: no per-step vector DMA.
                pl.BlockSpec(memory_space=pltpu.MemorySpace.SMEM),
                # lane-dense input row tile
                pl.BlockSpec((block_rows, lanes), lambda i: (i, 0)),
            ],
            out_specs=pl.BlockSpec((block_rows, lanes), lambda i: (i, 0)),
        ),
        compiler_params=pltpu.CompilerParams(
            dimension_semantics=("parallel",),
            vmem_limit_bytes=32 * 1024 * 1024,
        ),
    )(packed_params, x_slab)

    # Drop the padding tail (padded lanes hold finite garbage, sliced off here).
    return out_slab.reshape(-1)[:n].reshape(n, 1)


if __name__ == "__main__":
    key = jax.random.PRNGKey(0)
    k1, k2, k3, k4 = jax.random.split(key, 4)
    # torch.nn.Linear-style uniform(-1/sqrt(fan_in), 1/sqrt(fan_in)) init.
    bound1 = 1.0                       # fan_in = 1  (hidden layer)
    bound2 = 1.0 / float(jnp.sqrt(20.0))  # fan_in = 20 (predict layer)
    w1 = jax.random.uniform(k1, (1, N_HIDDEN), jnp.float32, -bound1, bound1)
    b1 = jax.random.uniform(k2, (N_HIDDEN,), jnp.float32, -bound1, bound1)
    w2 = jax.random.uniform(k3, (N_HIDDEN, 1), jnp.float32, -bound2, bound2)
    b2 = jax.random.uniform(k4, (1,), jnp.float32, -bound2, bound2)

    packed = pack_params(w1, b1, w2, b2)

    # Same input as the torch spec: torch.unsqueeze(torch.linspace(-1, 1, 1000), 1)
    n = 1000
    x = jnp.linspace(-1.0, 1.0, n, dtype=jnp.float32).reshape(n, 1)

    y = jax.block_until_ready(net_forward(x, packed))

    # Plain-JAX reference of the original module: predict(relu(hidden(x)))
    y_ref = jnp.maximum(x @ w1 + b1.reshape(1, -1), 0.0) @ w2 + b2.reshape(1, 1)
    assert y.shape == (n, 1)
    max_err = float(jnp.max(jnp.abs(y - y_ref)))
    assert jnp.allclose(y, y_ref, atol=5e-5, rtol=1e-4), max_err

    print("KERNEL_OK")
</pallas_src>

<mosaic_0001>
module attributes {stable_mosaic.version = 11 : i64} {
  func.func @mlp_kernel(%arg0: i32, %arg1: memref<42xf32, #tpu.memory_space<smem>>, %arg2: memref<8x128xf32, #tpu.memory_space<vmem>>, %arg3: memref<8x128xf32, #tpu.memory_space<vmem>>) attributes {dimension_semantics = [#tpu.dimension_semantics<parallel>], iteration_bounds = array<i64: 1>, scalar_prefetch = 0 : i64, scratch_operands = 0 : i64, tpu.core_type = #tpu.core_type<tc>, window_params = [{transform_indices = @transform_0, window_bounds = array<i64: 42>}, {transform_indices = @transform_1, window_bounds = array<i64: 8, 128>}, {transform_indices = @transform_2, window_bounds = array<i64: 8, 128>}]} {
    %c0 = arith.constant 0 : index
    %0 = memref.load %arg1[%c0] : memref<42xf32, #tpu.memory_space<smem>>
    %c1 = arith.constant 1 : index
    %1 = memref.load %arg1[%c1] : memref<42xf32, #tpu.memory_space<smem>>
    %c2 = arith.constant 2 : index
    %2 = memref.load %arg1[%c2] : memref<42xf32, #tpu.memory_space<smem>>
    %c3 = arith.constant 3 : index
    %3 = memref.load %arg1[%c3] : memref<42xf32, #tpu.memory_space<smem>>
    %c4 = arith.constant 4 : index
    %4 = memref.load %arg1[%c4] : memref<42xf32, #tpu.memory_space<smem>>
    %c5 = arith.constant 5 : index
    %5 = memref.load %arg1[%c5] : memref<42xf32, #tpu.memory_space<smem>>
    %c6 = arith.constant 6 : index
    %6 = memref.load %arg1[%c6] : memref<42xf32, #tpu.memory_space<smem>>
    %c7 = arith.constant 7 : index
    %7 = memref.load %arg1[%c7] : memref<42xf32, #tpu.memory_space<smem>>
    %c8 = arith.constant 8 : index
    %8 = memref.load %arg1[%c8] : memref<42xf32, #tpu.memory_space<smem>>
    %c9 = arith.constant 9 : index
    %9 = memref.load %arg1[%c9] : memref<42xf32, #tpu.memory_space<smem>>
    %c10 = arith.constant 10 : index
    %10 = memref.load %arg1[%c10] : memref<42xf32, #tpu.memory_space<smem>>
    %c11 = arith.constant 11 : index
    %11 = memref.load %arg1[%c11] : memref<42xf32, #tpu.memory_space<smem>>
    %c12 = arith.constant 12 : index
    %12 = memref.load %arg1[%c12] : memref<42xf32, #tpu.memory_space<smem>>
    %c13 = arith.constant 13 : index
    %13 = memref.load %arg1[%c13] : memref<42xf32, #tpu.memory_space<smem>>
    %c14 = arith.constant 14 : index
    %14 = memref.load %arg1[%c14] : memref<42xf32, #tpu.memory_space<smem>>
    %c15 = arith.constant 15 : index
    %15 = memref.load %arg1[%c15] : memref<42xf32, #tpu.memory_space<smem>>
    %c16 = arith.constant 16 : index
    %16 = memref.load %arg1[%c16] : memref<42xf32, #tpu.memory_space<smem>>
    %c17 = arith.constant 17 : index
    %17 = memref.load %arg1[%c17] : memref<42xf32, #tpu.memory_space<smem>>
    %c18 = arith.constant 18 : index
    %18 = memref.load %arg1[%c18] : memref<42xf32, #tpu.memory_space<smem>>
    %c19 = arith.constant 19 : index
    %19 = memref.load %arg1[%c19] : memref<42xf32, #tpu.memory_space<smem>>
    %c20 = arith.constant 20 : index
    %20 = memref.load %arg1[%c20] : memref<42xf32, #tpu.memory_space<smem>>
    %c21 = arith.constant 21 : index
    %21 = memref.load %arg1[%c21] : memref<42xf32, #tpu.memory_space<smem>>
    %c22 = arith.constant 22 : index
    %22 = memref.load %arg1[%c22] : memref<42xf32, #tpu.memory_space<smem>>
    %c23 = arith.constant 23 : index
    %23 = memref.load %arg1[%c23] : memref<42xf32, #tpu.memory_space<smem>>
    %c24 = arith.constant 24 : index
    %24 = memref.load %arg1[%c24] : memref<42xf32, #tpu.memory_space<smem>>
    %c25 = arith.constant 25 : index
    %25 = memref.load %arg1[%c25] : memref<42xf32, #tpu.memory_space<smem>>
    %c26 = arith.constant 26 : index
    %26 = memref.load %arg1[%c26] : memref<42xf32, #tpu.memory_space<smem>>
    %c27 = arith.constant 27 : index
    %27 = memref.load %arg1[%c27] : memref<42xf32, #tpu.memory_space<smem>>
    %c28 = arith.constant 28 : index
    %28 = memref.load %arg1[%c28] : memref<42xf32, #tpu.memory_space<smem>>
    %c29 = arith.constant 29 : index
    %29 = memref.load %arg1[%c29] : memref<42xf32, #tpu.memory_space<smem>>
    %c30 = arith.constant 30 : index
    %30 = memref.load %arg1[%c30] : memref<42xf32, #tpu.memory_space<smem>>
    %c31 = arith.constant 31 : index
    %31 = memref.load %arg1[%c31] : memref<42xf32, #tpu.memory_space<smem>>
    %c32 = arith.constant 32 : index
    %32 = memref.load %arg1[%c32] : memref<42xf32, #tpu.memory_space<smem>>
    %c33 = arith.constant 33 : index
    %33 = memref.load %arg1[%c33] : memref<42xf32, #tpu.memory_space<smem>>
    %c34 = arith.constant 34 : index
    %34 = memref.load %arg1[%c34] : memref<42xf32, #tpu.memory_space<smem>>
    %c35 = arith.constant 35 : index
    %35 = memref.load %arg1[%c35] : memref<42xf32, #tpu.memory_space<smem>>
    %c36 = arith.constant 36 : index
    %36 = memref.load %arg1[%c36] : memref<42xf32, #tpu.memory_space<smem>>
    %c37 = arith.constant 37 : index
    %37 = memref.load %arg1[%c37] : memref<42xf32, #tpu.memory_space<smem>>
    %c38 = arith.constant 38 : index
    %38 = memref.load %arg1[%c38] : memref<42xf32, #tpu.memory_space<smem>>
    %c39 = arith.constant 39 : index
    %39 = memref.load %arg1[%c39] : memref<42xf32, #tpu.memory_space<smem>>
    %c40 = arith.constant 40 : index
    %40 = memref.load %arg1[%c40] : memref<42xf32, #tpu.memory_space<smem>>
    %c41 = arith.constant 41 : index
    %41 = memref.load %arg1[%c41] : memref<42xf32, #tpu.memory_space<smem>>
    %c0_i32 = arith.constant 0 : i32
    %c8_i32 = arith.constant 8 : i32
    %42 = arith.muli %c0_i32, %c8_i32 : i32
    %43 = tpu.assume_multiple %42, 8 : i32
    %44 = arith.index_cast %43 : i32 to index
    %c0_0 = arith.constant 0 : index
    %45 = vector.load %arg2[%44, %c0_0] : memref<8x128xf32, #tpu.memory_space<vmem>>, vector<8x128xf32>
    %46 = vector.broadcast %40 : f32 to vector<8x128xf32>
    %47 = arith.mulf %45, %46 : vector<8x128xf32>
    %48 = vector.broadcast %41 : f32 to vector<8x128xf32>
    %49 = arith.addf %47, %48 : vector<8x128xf32>
    %50 = vector.broadcast %0 : f32 to vector<8x128xf32>
    %51 = arith.addf %45, %50 : vector<8x128xf32>
    %52 = math.absf %51 : vector<8x128xf32>
    %53 = vector.broadcast %20 : f32 to vector<8x128xf32>
    %54 = arith.mulf %53, %52 : vector<8x128xf32>
    %55 = arith.addf %49, %54 : vector<8x128xf32>
    %56 = vector.broadcast %1 : f32 to vector<8x128xf32>
    %57 = arith.addf %45, %56 : vector<8x128xf32>
    %58 = math.absf %57 : vector<8x128xf32>
    %59 = vector.broadcast %21 : f32 to vector<8x128xf32>
    %60 = arith.mulf %59, %58 : vector<8x128xf32>
    %61 = arith.addf %55, %60 : vector<8x128xf32>
    %62 = vector.broadcast %2 : f32 to vector<8x128xf32>
    %63 = arith.addf %45, %62 : vector<8x128xf32>
    %64 = math.absf %63 : vector<8x128xf32>
    %65 = vector.broadcast %22 : f32 to vector<8x128xf32>
    %66 = arith.mulf %65, %64 : vector<8x128xf32>
    %67 = arith.addf %61, %66 : vector<8x128xf32>
    %68 = vector.broadcast %3 : f32 to vector<8x128xf32>
    %69 = arith.addf %45, %68 : vector<8x128xf32>
    %70 = math.absf %69 : vector<8x128xf32>
    %71 = vector.broadcast %23 : f32 to vector<8x128xf32>
    %72 = arith.mulf %71, %70 : vector<8x128xf32>
    %73 = arith.addf %67, %72 : vector<8x128xf32>
    %74 = vector.broadcast %4 : f32 to vector<8x128xf32>
    %75 = arith.addf %45, %74 : vector<8x128xf32>
    %76 = math.absf %75 : vector<8x128xf32>
    %77 = vector.broadcast %24 : f32 to vector<8x128xf32>
    %78 = arith.mulf %77, %76 : vector<8x128xf32>
    %79 = arith.addf %73, %78 : vector<8x128xf32>
    %80 = vector.broadcast %5 : f32 to vector<8x128xf32>
    %81 = arith.addf %45, %80 : vector<8x128xf32>
    %82 = math.absf %81 : vector<8x128xf32>
    %83 = vector.broadcast %25 : f32 to vector<8x128xf32>
    %84 = arith.mulf %83, %82 : vector<8x128xf32>
    %85 = arith.addf %79, %84 : vector<8x128xf32>
    %86 = vector.broadcast %6 : f32 to vector<8x128xf32>
    %87 = arith.addf %45, %86 : vector<8x128xf32>
    %88 = math.absf %87 : vector<8x128xf32>
    %89 = vector.broadcast %26 : f32 to vector<8x128xf32>
    %90 = arith.mulf %89, %88 : vector<8x128xf32>
    %91 = arith.addf %85, %90 : vector<8x128xf32>
    %92 = vector.broadcast %7 : f32 to vector<8x128xf32>
    %93 = arith.addf %45, %92 : vector<8x128xf32>
    %94 = math.absf %93 : vector<8x128xf32>
    %95 = vector.broadcast %27 : f32 to vector<8x128xf32>
    %96 = arith.mulf %95, %94 : vector<8x128xf32>
    %97 = arith.addf %91, %96 : vector<8x128xf32>
    %98 = vector.broadcast %8 : f32 to vector<8x128xf32>
    %99 = arith.addf %45, %98 : vector<8x128xf32>
    %100 = math.absf %99 : vector<8x128xf32>
    %101 = vector.broadcast %28 : f32 to vector<8x128xf32>
    %102 = arith.mulf %101, %100 : vector<8x128xf32>
    %103 = arith.addf %97, %102 : vector<8x128xf32>
    %104 = vector.broadcast %9 : f32 to vector<8x128xf32>
    %105 = arith.addf %45, %104 : vector<8x128xf32>
    %106 = math.absf %105 : vector<8x128xf32>
    %107 = vector.broadcast %29 : f32 to vector<8x128xf32>
    %108 = arith.mulf %107, %106 : vector<8x128xf32>
    %109 = arith.addf %103, %108 : vector<8x128xf32>
    %110 = vector.broadcast %10 : f32 to vector<8x128xf32>
    %111 = arith.addf %45, %110 : vector<8x128xf32>
    %112 = math.absf %111 : vector<8x128xf32>
    %113 = vector.broadcast %30 : f32 to vector<8x128xf32>
    %114 = arith.mulf %113, %112 : vector<8x128xf32>
    %115 = arith.addf %109, %114 : vector<8x128xf32>
    %116 = vector.broadcast %11 : f32 to vector<8x128xf32>
    %117 = arith.addf %45, %116 : vector<8x128xf32>
    %118 = math.absf %117 : vector<8x128xf32>
    %119 = vector.broadcast %31 : f32 to vector<8x128xf32>
    %120 = arith.mulf %119, %118 : vector<8x128xf32>
    %121 = arith.addf %115, %120 : vector<8x128xf32>
    %122 = vector.broadcast %12 : f32 to vector<8x128xf32>
    %123 = arith.addf %45, %122 : vector<8x128xf32>
    %124 = math.absf %123 : vector<8x128xf32>
    %125 = vector.broadcast %32 : f32 to vector<8x128xf32>
    %126 = arith.mulf %125, %124 : vector<8x128xf32>
    %127 = arith.addf %121, %126 : vector<8x128xf32>
    %128 = vector.broadcast %13 : f32 to vector<8x128xf32>
    %129 = arith.addf %45, %128 : vector<8x128xf32>
    %130 = math.absf %129 : vector<8x128xf32>
    %131 = vector.broadcast %33 : f32 to vector<8x128xf32>
    %132 = arith.mulf %131, %130 : vector<8x128xf32>
    %133 = arith.addf %127, %132 : vector<8x128xf32>
    %134 = vector.broadcast %14 : f32 to vector<8x128xf32>
    %135 = arith.addf %45, %134 : vector<8x128xf32>
    %136 = math.absf %135 : vector<8x128xf32>
    %137 = vector.broadcast %34 : f32 to vector<8x128xf32>
    %138 = arith.mulf %137, %136 : vector<8x128xf32>
    %139 = arith.addf %133, %138 : vector<8x128xf32>
    %140 = vector.broadcast %15 : f32 to vector<8x128xf32>
    %141 = arith.addf %45, %140 : vector<8x128xf32>
    %142 = math.absf %141 : vector<8x128xf32>
    %143 = vector.broadcast %35 : f32 to vector<8x128xf32>
    %144 = arith.mulf %143, %142 : vector<8x128xf32>
    %145 = arith.addf %139, %144 : vector<8x128xf32>
    %146 = vector.broadcast %16 : f32 to vector<8x128xf32>
    %147 = arith.addf %45, %146 : vector<8x128xf32>
    %148 = math.absf %147 : vector<8x128xf32>
    %149 = vector.broadcast %36 : f32 to vector<8x128xf32>
    %150 = arith.mulf %149, %148 : vector<8x128xf32>
    %151 = arith.addf %145, %150 : vector<8x128xf32>
    %152 = vector.broadcast %17 : f32 to vector<8x128xf32>
    %153 = arith.addf %45, %152 : vector<8x128xf32>
    %154 = math.absf %153 : vector<8x128xf32>
    %155 = vector.broadcast %37 : f32 to vector<8x128xf32>
    %156 = arith.mulf %155, %154 : vector<8x128xf32>
    %157 = arith.addf %151, %156 : vector<8x128xf32>
    %158 = vector.broadcast %18 : f32 to vector<8x128xf32>
    %159 = arith.addf %45, %158 : vector<8x128xf32>
    %160 = math.absf %159 : vector<8x128xf32>
    %161 = vector.broadcast %38 : f32 to vector<8x128xf32>
    %162 = arith.mulf %161, %160 : vector<8x128xf32>
    %163 = arith.addf %157, %162 : vector<8x128xf32>
    %164 = vector.broadcast %19 : f32 to vector<8x128xf32>
    %165 = arith.addf %45, %164 : vector<8x128xf32>
    %166 = math.absf %165 : vector<8x128xf32>
    %167 = vector.broadcast %39 : f32 to vector<8x128xf32>
    %168 = arith.mulf %167, %166 : vector<8x128xf32>
    %169 = arith.addf %163, %168 : vector<8x128xf32>
    %170 = arith.index_cast %43 : i32 to index
    %c0_1 = arith.constant 0 : index
    %171 = vector.load %arg3[%170, %c0_1] : memref<8x128xf32, #tpu.memory_space<vmem>>, vector<8x128xf32>
    tpu.vector_store %arg3[%170, %c0_1], %169 {strides = array<i32>} : memref<8x128xf32, #tpu.memory_space<vmem>>, vector<8x128xf32>,
    %c1_i32 = arith.constant 1 : i32
    return
  }
  func.func @transform_0(%arg0: i32) -> i32 {
    %c0_i32 = arith.constant 0 : i32
    %c0_i32_0 = arith.constant 0 : i32
    return %c0_i32 : i32
  }
  func.func @transform_1(%arg0: i32) -> (i32, i32) {
    %c0_i32 = arith.constant 0 : i32
    %c0_i32_0 = arith.constant 0 : i32
    return %arg0, %c0_i32 : i32, i32
  }
  func.func @transform_2(%arg0: i32) -> (i32, i32) {
    %c0_i32 = arith.constant 0 : i32
    %c0_i32_0 = arith.constant 0 : i32
    return %arg0, %c0_i32 : i32, i32
  }
}

</mosaic_0001>

<bundles_post_ra>
// kernel: net_forward.1
= control target key start
LH: loop header
LB: loop body
LE: loop exit
PB: predicated region body
PF: predicated region fallthrough
CT: control target
= control target key end

     0   :  { %7 = vsyncpa [#allocation4], 0  ;;  %s449_s0 = inlined_call_operand.vmem [shape: f32[42], index: 0, kind: input, shape index: {}]   ;;  %s450_s1 = inlined_call_operand.vmem [shape: f32[8,128], index: 1, kind: input, shape index: {}]   ;;  %s451_s2 = inlined_call_operand.hbm [shape: f32[8,128], index: 2, kind: output, shape index: {}]  }
   0x1   :  { %8 = vsyncpa [#allocation3], 0  ;;  %s15_s11 = sshll.u32 %s449_s0, 4  ;;  %s16_s11 = int_to_ptr.vmem [resolvable:$true] %s15_s11 }
   0x2   :  { %s251_s12 = scalar_lea.vmem %s16_s11, 16  ;;  %p256_p1 = scmp.lt.s32.totalorder %s16_s11, %s16_s11 }
   0x3   :  { %p252_p0 = scmp.ne.s32.totalorder %s16_s11, %s251_s12  ;;  %p257_p2 = scmp.lt.s32.totalorder %s251_s12, %s251_s12 }
   0x5   :  { %p258_p3 = por %p257_p2, %p256_p1 }
   0x7   :  { %p259_p4 = pnand %p258_p3, %p252_p0 }
   0x9   :  { %262 = shalt.err (!%p259_p4)
}
   0xa   :  { %s289_s13 = smov [#allocation2]  }
   0xb   :  { %18 = dma.vmem_to_smem %s16_s11, 16, %s289_s13, [#allocation4]  }
   0xc   :  { %285 = dma.done.wait [#allocation4], 16  }
   0xd   :  { %286 = vsyncadd [#allocation4], 4294967280 }
   0xe   :  { %24 = sfence }
   0xf   :  { %s25_s14 = sld [smem:[#allocation2]]  ;;  %s208_s15 = sld [smem:[#allocation2 + $0x1]]  ;;  %v316_v0 = vld [vmem:[%s450_s1] sm:$0xff] }
  0x10   :  { %s209_s16 = sld [smem:[#allocation2 + $0x2]]  ;;  %s210_s17 = sld [smem:[#allocation2 + $0x3]] }
  0x11   :  { %s309_s18 = sld [smem:[#allocation2 + $0x4]]  ;;  %s318_s21 = sld [smem:[#allocation2 + $0x5]] }
  0x12   :  { %s311_s0 = sld [smem:[#allocation2 + $0x14]]  ;;  %s320_s22 = sld [smem:[#allocation2 + $0x15]] }
  0x13   :  { %s322_s23 = sld [smem:[#allocation2 + $0x6]]  ;;  %s247_s25 = sld [smem:[#allocation2 + $0x28]] }
  0x14   :  { %s324_s24 = sld [smem:[#allocation2 + $0x16]]  ;;  %s248_s26 = sld [smem:[#allocation2 + $0x29]] }
  0x15   :  { %v72_v1 = vstv %s25_s14  ;;  %v78_v2 = vstv %s208_s15  ;;  %s328_s1 = sld [smem:[#allocation2 + $0x7]]  ;;  %s333_s28 = sld [smem:[#allocation2 + $0x8]] }
  0x16   :  { %v73_v3 = vadd.f32 %v72_v1, %v316_v0  ;;  %v84_v4 = vstv %s209_s16  ;;  %v79_v5 = vadd.f32 %v78_v2, %v316_v0  ;;  %s330_s27 = sld [smem:[#allocation2 + $0x17]]  ;;  %v90_v6 = vstv %s210_s17  ;;  %s335_s29 = sld [smem:[#allocation2 + $0x18]] }
  0x17   :  { %v85_v8 = vadd.f32 %v84_v4, %v316_v0  ;;  %v96_v10 = vstv %s309_s18  ;;  %v91_v12 = vadd.f32 %v90_v6, %v316_v0  ;;  %s340_s30 = sld [smem:[#allocation2 + $0x9]]  ;;  %v102_v16 = vstv %s318_s21  ;;  %s348_s4 = sld [smem:[#allocation2 + $0xa]] }
  0x18   :  { %v74_v7 = vand.u32 2147483647, %v73_v3  ;;  %v75_v9 = vstv %s311_s0  ;;  %v80_v11 = vand.u32 2147483647, %v79_v5  ;;  %s342_s3 = sld [smem:[#allocation2 + $0x19]]  ;;  %v81_v15 = vstv %s320_s22  ;;  %s350_s5 = sld [smem:[#allocation2 + $0x1a]] }
  0x19   :  { %v68_v13 = vstv %s247_s25  ;;  %v86_v19 = vand.u32 2147483647, %v85_v8  ;;  %v97_v20 = vadd.f32 %v96_v10, %v316_v0  ;;  %v108_v22 = vstv %s322_s23  ;;  %s355_s6 = sld [smem:[#allocation2 + $0xb]]  ;;  %s362_s8 = sld [smem:[#allocation2 + $0xc]] }
  0x1a   :  { %v70_v14 = vstv %s248_s26  ;;  %v69_v17 = vmul.f32 %v68_v13, %v316_v0  ;;  %v76_v18 = vmul.f32 %v75_v9, %v74_v7  ;;  %v87_v21 = vstv %s324_s24  ;;  %s357_s7 = sld [smem:[#allocation2 + $0x1b]]  ;;  %s364_s9 = sld [smem:[#allocation2 + $0x1c]] }
  0x1b   :  { %v82_v24 = vmul.f32 %v81_v15, %v80_v11  ;;  %v92_v25 = vand.u32 2147483647, %v91_v12  ;;  %v103_v26 = vadd.f32 %v102_v16, %v316_v0  ;;  %v114_v28 = vstv %s328_s1  ;;  %s369_s10 = sld [smem:[#allocation2 + $0xd]]  ;;  %s376_s12 = sld [smem:[#allocation2 + $0xe]] }
  0x1c   :  { %v71_v23 = vadd.f32 %v70_v14, %v69_v17  ;;  %v93_v27 = vstv %s330_s27  ;;  %v88_v30 = vmul.f32 %v87_v21, %v86_v19  ;;  %v98_v31 = vand.u32 2147483647, %v97_v20  ;;  %s371_s11 = sld [smem:[#allocation2 + $0x1d]]  ;;  %s378_s13 = sld [smem:[#allocation2 + $0x1e]] }
  0x1d   :  { %v109_v32 = vadd.f32 %v108_v22, %v316_v0  ;;  %v99_v33 = vstv %s335_s29  ;;  %v120_v34 = vstv %s333_s28  ;;  %v94_v36 = vmul.f32 %v93_v27, %v92_v25  ;;  %s383_s14 = sld [smem:[#allocation2 + $0xf]]  ;;  %s390_s16 = sld [smem:[#allocation2 + $0x10]] }
  0x1e   :  { %v77_v29 = vadd.f32 %v76_v18, %v71_v23  ;;  %v104_v37 = vand.u32 2147483647, %v103_v26  ;;  %v115_v38 = vadd.f32 %v114_v28, %v316_v0  ;;  %v105_v39 = vstv %s342_s3  ;;  %s385_s15 = sld [smem:[#allocation2 + $0x1f]]  ;;  %s392_s17 = sld [smem:[#allocation2 + $0x20]] }
  0x1f   :  { %v126_v40 = vstv %s340_s30  ;;  %v100_v42 = vmul.f32 %v99_v33, %v98_v31  ;;  %v110_v43 = vand.u32 2147483647, %v109_v32  ;;  %v121_v44 = vadd.f32 %v120_v34, %v316_v0  ;;  %s397_s18 = sld [smem:[#allocation2 + $0x11]]  ;;  %s404_s19 = sld [smem:[#allocation2 + $0x12]] }
  0x20   :  { %v83_v35 = vadd.f32 %v82_v24, %v77_v29  ;;  %v111_v45 = vstv %s350_s5  ;;  %v132_v46 = vstv %s348_s4  ;;  %v106_v48 = vmul.f32 %v105_v39, %v104_v37  ;;  %s399_s0 = sld [smem:[#allocation2 + $0x21]]  ;;  %s406_s20 = sld [smem:[#allocation2 + $0x22]] }
  0x21   :  { %v116_v49 = vand.u32 2147483647, %v115_v38  ;;  %v127_v50 = vadd.f32 %v126_v40, %v316_v0  ;;  %v117_v51 = vstv %s357_s7  ;;  %v138_v52 = vstv %s355_s6  ;;  %s411_s21 = sld [smem:[#allocation2 + $0x13]]  ;;  %s418_s23 = sld [smem:[#allocation2 + $0x24]] }
  0x22   :  { %v89_v41 = vadd.f32 %v88_v30, %v83_v35  ;;  %v112_v54 = vmul.f32 %v111_v45, %v110_v43  ;;  %v122_v55 = vand.u32 2147483647, %v121_v44  ;;  %v133_v56 = vadd.f32 %v132_v46, %v316_v0  ;;  %s413_s22 = sld [smem:[#allocation2 + $0x23]]  ;;  %s423_s24 = sld [smem:[#allocation2 + $0x25]] }
  0x23   :  { %v123_v57 = vstv %s364_s9  ;;  %v144_v58 = vstv %s362_s8  ;;  %v118_v60 = vmul.f32 %v117_v51, %v116_v49  ;;  %v128_v61 = vand.u32 2147483647, %v127_v50  ;;  %s245_s25 = sld [smem:[#allocation2 + $0x26]]  ;;  %s246_s26 = sld [smem:[#allocation2 + $0x27]] }
  0x24   :  { %v95_v47 = vadd.f32 %v94_v36, %v89_v41  ;;  %v139_v62 = vadd.f32 %v138_v52, %v316_v0  ;;  %v129_v63 = vstv %s371_s11  ;;  %v150_v1 = vstv %s369_s10  ;;  %s290_s1 = smov [#allocation5]  }
  0x25   :  { %v124_v3 = vmul.f32 %v123_v57, %v122_v55  ;;  %v134_v4 = vand.u32 2147483647, %v133_v56  ;;  %v145_v5 = vadd.f32 %v144_v58, %v316_v0  ;;  %v135_v6 = vstv %s378_s13  ;;  %s199_s27 = sshll.u32 %s290_s1, 4  ;;  %s200_s27 = int_to_ptr.vmem [resolvable:$true] %s199_s27 }
  0x26   :  { %v101_v53 = vadd.f32 %v100_v42, %v95_v47  ;;  %v156_v7 = vstv %s376_s12  ;;  %v130_v9 = vmul.f32 %v129_v63, %v128_v61  ;;  %v140_v10 = vand.u32 2147483647, %v139_v62  ;;  %s263_s28 = scalar_lea.vmem %s200_s27, 128  ;;  %p268_p6 = scmp.lt.s32.totalorder %s200_s27, %s200_s27 }
  0x27   :  { %v151_v11 = vadd.f32 %v150_v1, %v316_v0  ;;  %v141_v12 = vstv %s385_s15  ;;  %v162_v13 = vstv %s383_s14  ;;  %v136_v15 = vmul.f32 %v135_v6, %v134_v4  ;;  %p264_p5 = scmp.ne.s32.totalorder %s200_s27, %s263_s28  ;;  %p269_p7 = scmp.lt.s32.totalorder %s263_s28, %s263_s28 }
  0x28   :  { %v107_v59 = vadd.f32 %v106_v48, %v101_v53  ;;  %v146_v16 = vand.u32 2147483647, %v145_v5  ;;  %v157_v17 = vadd.f32 %v156_v7, %v316_v0  ;;  %v147_v18 = vstv %s392_s17 }
  0x29   :  { %v168_v19 = vstv %s390_s16  ;;  %v142_v21 = vmul.f32 %v141_v12, %v140_v10  ;;  %v152_v22 = vand.u32 2147483647, %v151_v11  ;;  %v163_v23 = vadd.f32 %v162_v13, %v316_v0  ;;  %p270_p8 = por %p269_p7, %p268_p6 }
  0x2a   :  { %v113_v2 = vadd.f32 %v112_v54, %v107_v59  ;;  %v153_v24 = vstv %s399_s0  ;;  %v174_v25 = vstv %s397_s18  ;;  %v148_v27 = vmul.f32 %v147_v18, %v146_v16 }
  0x2b   :  { %v158_v28 = vand.u32 2147483647, %v157_v17  ;;  %v169_v29 = vadd.f32 %v168_v19, %v316_v0  ;;  %v159_v30 = vstv %s406_s20  ;;  %v180_v31 = vstv %s404_s19  ;;  %p271_p9 = pnand %p270_p8, %p264_p5 }
  0x2c   :  { %v119_v8 = vadd.f32 %v118_v60, %v113_v2  ;;  %v154_v33 = vmul.f32 %v153_v24, %v152_v22  ;;  %v164_v34 = vand.u32 2147483647, %v163_v23  ;;  %v175_v35 = vadd.f32 %v174_v25, %v316_v0 }
  0x2d   :  { %v165_v36 = vstv %s413_s22  ;;  %v186_v37 = vstv %s411_s21  ;;  %v160_v39 = vmul.f32 %v159_v30, %v158_v28  ;;  %v170_v40 = vand.u32 2147483647, %v169_v29 }
  0x2e   :  { %v125_v14 = vadd.f32 %v124_v3, %v119_v8  ;;  %v181_v41 = vadd.f32 %v180_v31, %v316_v0  ;;  %v171_v42 = vstv %s418_s23  ;;  %v166_v44 = vmul.f32 %v165_v36, %v164_v34 }
  0x2f   :  { %v176_v45 = vand.u32 2147483647, %v175_v35  ;;  %v187_v46 = vadd.f32 %v186_v37, %v316_v0  ;;  %v177_v47 = vstv %s423_s24  ;;  %v172_v49 = vmul.f32 %v171_v42, %v170_v40 }
  0x30   :  { %v131_v20 = vadd.f32 %v130_v9, %v125_v14  ;;  %v182_v50 = vand.u32 2147483647, %v181_v41  ;;  %v183_v51 = vstv %s245_s25  ;;  %v189_v55 = vstv %s246_s26 }
  0x31   :  { %v178_v53 = vmul.f32 %v177_v47, %v176_v45  ;;  %v188_v54 = vand.u32 2147483647, %v187_v46 }
  0x32   :  { %v137_v26 = vadd.f32 %v136_v15, %v131_v20  ;;  %v184_v57 = vmul.f32 %v183_v51, %v182_v50 }
  0x33   :  { %v190_v59 = vmul.f32 %v189_v55, %v188_v54 }
  0x34   :  { %v143_v32 = vadd.f32 %v142_v21, %v137_v26 }
  0x36   :  { %v149_v38 = vadd.f32 %v148_v27, %v143_v32 }
  0x38   :  { %v155_v43 = vadd.f32 %v154_v33, %v149_v38 }
  0x3a   :  { %v161_v48 = vadd.f32 %v160_v39, %v155_v43 }
  0x3c   :  { %v167_v52 = vadd.f32 %v166_v44, %v161_v48 }
  0x3e   :  { %v173_v56 = vadd.f32 %v172_v49, %v167_v52 }
  0x40   :  { %v179_v58 = vadd.f32 %v178_v53, %v173_v56 }
  0x42   :  { %v185_v60 = vadd.f32 %v184_v57, %v179_v58 }
  0x44   :  { %v191_v61 = vadd.f32 %v190_v59, %v185_v60 }
  0x46   :  { %192 = vst [vmem:[#allocation5] sm:$0xff] %v191_v61 }
  0x47   :  { %274 = shalt.err (!%p271_p9)
}
  0x48   :  { %s275_s3 = scalar_lea.hbm %s451_s2, 128 }
  0x49   :  { %p276_p10 = scmp.ne.s32.totalorder %s451_s2, %s275_s3  ;;  %p279_p11 = scmp.lt.u32.totalorder %s275_s3, %s451_s2 }
  0x4b   :  { %p281_p12 = pnand %p279_p11, %p276_p10 }
  0x4d   :  { %284 = shalt.err (!%p281_p12)
}
  0x4e   :  { %202 = dma.vmem_to_hbm [thread:$0]  %s200_s27, 128, %s451_s2, [#allocation3]  }
  0x4f   :  { %287 = dma.done.wait [#allocation3], 128  }
  0x50   :  { %288 = vsyncadd [#allocation3], 4294967168 }
  0x51   :  { %206 = vsyncpa [#allocation3], 1 }
  0x52   :  { %207 = vsyncpa [#allocation4], 1 }

</bundles_post_ra>
